<compile_context>
chip_gen: v6e
topology: v6e:2x2x1
jax: 0.10.0
libtpu: 0.0.40
codegen_flags: <defaults>
</compile_context>

<pallas_src>
import functools

import jax
import jax.numpy as jnp
from jax.experimental import pallas as pl
from jax.experimental.pallas import tpu as pltpu


def _fused_state_kernel(a_ref, x_ref, o_ref):
    # a_ref: (C, C)           fused transform A = Qinv @ diag(e) @ Q (resident)
    # x_ref: (1, C, tile_s)   channel-major input block, spatial on lanes
    # o_ref: (1, C, tile_s)
    o_ref[0] = jnp.dot(
        a_ref[...], x_ref[0], preferred_element_type=jnp.float32
    ).astype(o_ref.dtype)


@functools.partial(jax.jit, static_argnames=("tile_s",))
def _apply_channel_matrix(A, x3, *, tile_s):
    """y[b] = A @ x3[b] for x3 of shape (B, C, HW_pad); HW_pad % tile_s == 0."""
    B, C, hw_pad = x3.shape
    grid = (B, hw_pad // tile_s)
    return pl.pallas_call(
        _fused_state_kernel,
        out_shape=jax.ShapeDtypeStruct((B, C, hw_pad), x3.dtype),
        grid_spec=pltpu.PrefetchScalarGridSpec(
            num_scalar_prefetch=0,
            grid=grid,
            in_specs=[
                pl.BlockSpec((C, C), lambda b, s: (0, 0)),          # A, resident
                pl.BlockSpec((1, C, tile_s), lambda b, s: (b, 0, s)),
            ],
            out_specs=pl.BlockSpec((1, C, tile_s), lambda b, s: (b, 0, s)),
        ),
        compiler_params=pltpu.CompilerParams(
            dimension_semantics=("parallel", "parallel"),
        ),
    )(A, x3)


def _round_up(x, m):
    return ((x + m - 1) // m) * m


def _choose_tile(hw, batch, channels, max_tile):
    # Cap each block at ~4 MiB f32 so 2x(in)+2x(out) double-buffered blocks stay
    # well under the v7x 32 MiB scoped-VMEM default (generous on v5e/v6e too).
    vmem_cap = max(128, (4 << 20) // (4 * channels))
    max_tile = min(max_tile, _round_up(vmem_cap, 128))
    tile = min(max_tile, _round_up(hw, 128))
    # Keep >= 2 grid steps so both v7x TensorCores get work (neutral on v5e/v6e).
    while batch * (_round_up(hw, tile) // tile) < 2 and tile > 128:
        tile = _round_up(max(128, tile // 2), 128)
    return tile


def state_expdecay_forward(x_nchw, Q, Qinv, S, *, tau=0.1, alpha=1.0, T=5,
                           T_param=1.0, max_tile=8192):
    """Forward pass of StateExpDecay.

    x_nchw: (B, C, H, W) float32.  Q, Qinv: (C, C).  S: (C,) trainable param.
    """
    B, C, H, W = x_nchw.shape

    # Per-channel decay e = exp(T_total * (1/tau) * -|S|^alpha), T_total = self.T*T.
    delta = (1.0 / tau) * -1.0 * jnp.abs(S) ** alpha
    e = jnp.exp(T_param * T * delta)

    # Fold Qinv @ diag(e) @ Q into one C x C constant matrix (computed once).
    A = (Qinv * e[None, :]) @ Q

    hw = H * W
    x3 = x_nchw.reshape(B, C, hw)          # free reshape: NCHW is channel-major
    tile_s = _choose_tile(hw, B, C, max_tile)
    hw_pad = _round_up(hw, tile_s)
    if hw_pad != hw:
        # zero padding is exact: A @ 0 = 0, padded columns are sliced off below
        x3 = jnp.pad(x3, ((0, 0), (0, 0), (0, hw_pad - hw)))

    y3 = _apply_channel_matrix(A.astype(x3.dtype), x3, tile_s=tile_s)

    if hw_pad != hw:
        y3 = y3[:, :, :hw]
    return y3.reshape(B, C, H, W)


if __name__ == "__main__":
    # filters=32, shape=(16,16), batch=2 — small but representative
    B, C, H, W = 2, 32, 16, 16
    tau, alpha, T = 0.5, 1.0, 5

    key = jax.random.PRNGKey(0)
    k_x, k_w, k_s = jax.random.split(key, 3)

    x = jax.random.normal(k_x, (B, C, H, W), jnp.float32)

    # --- deterministic re-creation of StateExpDecay.__init__ constants ------
    bound = jnp.sqrt(6.0 / (C + C))                          # xavier_uniform_
    Wmat = jax.random.uniform(k_w, (C, C), jnp.float32, -bound, bound)
    M = Wmat @ Wmat.T                                        # symmetric PSD
    _, Q = jnp.linalg.eigh(M)                                # real eigenvectors
    Q = Q.astype(jnp.float32)
    Qinv = jnp.linalg.inv(Q).astype(jnp.float32)
    # torch.nn.init.ones_(self.S).  S is a *trainable* parameter, so we test with
    # a perturbed value to exercise the full eigen-basis decay path (the forward
    # semantics are unchanged; with S == ones the layer degenerates to y = e * x).
    S = jnp.ones((C,), jnp.float32) + 0.3 * jax.random.normal(k_s, (C,), jnp.float32)

    y = state_expdecay_forward(x, Q, Qinv, S, tau=tau, alpha=alpha, T=T)
    y = jax.block_until_ready(y)

    # Pure-JAX reference in the original (unfused, NHWC) op order.
    e = jnp.exp(1.0 * T * (1.0 / tau) * -1.0 * jnp.abs(S) ** alpha)
    x_nhwc = jnp.transpose(x, (0, 2, 3, 1))
    ref = ((x_nhwc @ Q.T) * e) @ Qinv.T
    ref = jnp.transpose(ref, (0, 3, 1, 2))

    assert y.shape == (B, C, H, W)
    assert jnp.allclose(y, ref, rtol=1e-4, atol=1e-5), float(jnp.max(jnp.abs(y - ref)))

    # TODO(synk): ExpDecay's custom Neumann-series backward is autograd-only; this
    # script implements the forward pass (the unused `self.state` buffer is omitted).
    print("KERNEL_OK")
</pallas_src>

<mosaic_0001>
module attributes {stable_mosaic.version = 11 : i64} {
  func.func @_fused_state_kernel(%arg0: i32, %arg1: i32, %arg2: memref<32x32xf32, #tpu.memory_space<vmem>>, %arg3: memref<1x32x256xf32, #tpu.memory_space<vmem>>, %arg4: memref<1x32x256xf32, #tpu.memory_space<vmem>>) attributes {dimension_semantics = [#tpu.dimension_semantics<parallel>, #tpu.dimension_semantics<parallel>], iteration_bounds = array<i64: 2, 1>, scalar_prefetch = 0 : i64, scratch_operands = 0 : i64, tpu.core_type = #tpu.core_type<tc>, window_params = [{pipeline_mode = #tpu.pipeline_mode<synchronous>, transform_indices = @transform_0, window_bounds = array<i64: 32, 32>}, {transform_indices = @transform_1, window_bounds = array<i64: 1, 32, 256>}, {transform_indices = @transform_2, window_bounds = array<i64: 1, 32, 256>}]} {
    %c0 = arith.constant 0 : index
    %c0_0 = arith.constant 0 : index
    %0 = vector.load %arg2[%c0, %c0_0] : memref<32x32xf32, #tpu.memory_space<vmem>>, vector<32x32xf32>
    %c0_1 = arith.constant 0 : index
    %c0_2 = arith.constant 0 : index
    %c0_3 = arith.constant 0 : index
    %1 = vector.load %arg3[%c0_1, %c0_2, %c0_3] : memref<1x32x256xf32, #tpu.memory_space<vmem>>, vector<1x32x256xf32>
    %2 = vector.shape_cast %1 : vector<1x32x256xf32> to vector<32x256xf32>
    %cst = arith.constant dense<0.000000e+00> : vector<32x256xf32>
    %3 = tpu.matmul %0, %2, %cst {dimension_numbers = #tpu.dot_dimension_numbers<[1], [0], [0], [1], [0, 0, 1, 1], [], []>} : vector<32x32xf32>, vector<32x256xf32>, vector<32x256xf32> -> vector<32x256xf32>
    %c0_4 = arith.constant 0 : index
    %c0_5 = arith.constant 0 : index
    %c0_6 = arith.constant 0 : index
    %4 = vector.load %arg4[%c0_4, %c0_5, %c0_6] : memref<1x32x256xf32, #tpu.memory_space<vmem>>, vector<1x32x256xf32>
    %5 = vector.shape_cast %4 : vector<1x32x256xf32> to vector<32x256xf32>
    %6 = vector.shape_cast %3 : vector<32x256xf32> to vector<1x32x256xf32>
    tpu.vector_store %arg4[%c0_4, %c0_5, %c0_6], %6 {strides = array<i32>} : memref<1x32x256xf32, #tpu.memory_space<vmem>>, vector<1x32x256xf32>,
    return
  }
  func.func @transform_0(%arg0: i32, %arg1: i32) -> (i32, i32) {
    %c0_i32 = arith.constant 0 : i32
    %c0_i32_0 = arith.constant 0 : i32
    %c0_i32_1 = arith.constant 0 : i32
    return %c0_i32, %c0_i32_0 : i32, i32
  }
  func.func @transform_1(%arg0: i32, %arg1: i32) -> (i32, i32, i32) {
    %c0_i32 = arith.constant 0 : i32
    %c0_i32_0 = arith.constant 0 : i32
    return %arg0, %c0_i32, %arg1 : i32, i32, i32
  }
  func.func @transform_2(%arg0: i32, %arg1: i32) -> (i32, i32, i32) {
    %c0_i32 = arith.constant 0 : i32
    %c0_i32_0 = arith.constant 0 : i32
    return %arg0, %c0_i32, %arg1 : i32, i32, i32
  }
}

</mosaic_0001>

<bundles_post_ra>
// kernel: _apply_channel_matrix.1
= control target key start
LH: loop header
LB: loop body
LE: loop exit
PB: predicated region body
PF: predicated region fallthrough
CT: control target
= control target key end

     0   :  { %7 = vsyncpa [#allocation3], 0  ;;  %s895_s0 = inlined_call_operand.hbm [shape: f32[32,32], index: 0, kind: input, shape index: {}]   ;;  %s896_s1 = inlined_call_operand.hbm [shape: f32[2,32,256], index: 1, kind: input, shape index: {}]   ;;  %s897_s2 = inlined_call_operand.hbm [shape: f32[2,32,256], index: 2, kind: output, shape index: {}]  }
   0x1   :  { %8 = vsyncpa [#allocation6], 0 }
   0x2   :  { %10 = vsyncpa [#allocation6 + $0x1], 0 }
   0x3   :  { %11 = vsyncpa [#allocation4], 0 }
   0x4   :  { %13 = vsyncpa [#allocation4 + $0x1], 0  ;;  %s710_s9 = smov 0   ;;  %s712_s10 = smov 0  }
   0x5   :  { %s714_s11 = smov 0   ;;  %s716_s12 = smov 0  }
   0x6   :  { %s718_s13 = smov 0   ;;  %s720_s14 = smov 0  }
   0x7 LB: > { %s434_s15 = sadd.s32 4294967295, %s683_s14   ;;  %s435_s16 = sadd.s32 4294967294, %s683_s14   ;;  %s683_s14 = sphi %s720_s14, %s19_s14   ;;  %s679_s13 = sphi %s718_s13, %s915_s13   ;;  %s675_s12 = sphi %s716_s12, %s914_s12   ;;  %s671_s11 = sphi %s714_s11, %s913_s11   ;;  %s667_s10 = sphi %s712_s10, %s912_s10   ;;  %s663_s9 = sphi %s710_s9, %s911_s9  }
   0x8   : > { %p74_p0 = scmp.ne.s32.totalorder %s667_s10, %s663_s9  ;;  %p744_p1 = scmp.eq.s32.totalorder %s434_s15, 0 }
   0x9   : > { %p748_p2 = scmp.eq.s32.totalorder %s434_s15, 1  ;;  %p106_p3 = scmp.eq.s32.totalorder %s435_s16, 1 }
   0xa   : > { %p754_p4 = por %p744_p1, %p74_p0  ;;  %p436_p5 = scmp.ge.s32.totalorder %s683_s14, 1 }
   0xb   : > { %p759_p6 = por %p106_p3, %p74_p0  ;;  %p113_p7 = scmp.lt.s32.totalorder %s683_s14, 3 }
   0xc   : > { %s901_s19 = scalar_select %p754_p4, 1, 0 }
   0xd   : > { %s902_s20 = scalar_select %p759_p6, 1, 0 }
   0xe   : > { %p764_p8 = pnand %p436_p5, %p113_p7  ;;  %s685_s22 = smov [#allocation2]  }
   0xf   : > { %s125_s23 = sshll.u32 %s685_s22, 4  ;;  %s31_s25 = sadd.s32 1, %s679_s13  ;;  %s126_s23 = int_to_ptr.vmem [resolvable:$true] %s125_s23 }
  0x10   : > { %p473_p9 = pneg %p764_p8  ;;  %s556_s26 = scalar_lea.vmem %s126_s23, 512 }
  0x11   : > { %p557_p13 = scmp.ne.s32.totalorder %s126_s23, %s556_s26  ;;  %p564_p5 = scmp.lt.s32.totalorder %s126_s23, %s126_s23 }
  0x12   : > { %p773_p11 = pnand %p473_p9, %p744_p1  ;;  %p565_p7 = scmp.lt.s32.totalorder %s556_s26, %s556_s26 }
  0x14   : > { %p547_p12 = pneg %p773_p11  ;;  %p566_p6 = por %p565_p7, %p564_p5 }
  0x16   : > { %p559_p0 = pnand %p557_p13, %p547_p12 }
  0x18   : > { %p560_p3 = pneg %p559_p0 }
  0x1a   : > { %p567_p4 = pnand %p566_p6, %p560_p3 }
  0x1c   : > { %570 = shalt.err (!%p567_p4)
}
  0x1d   : > { %s686_s27 = smov 128   ;;  %s687_s28 = smov 8  }
  0x1e   : > { %476 = dma.hbm_to_vmem [thread:$0]  (!%p773_p11), %s895_s0, 512, %s126_s23, [#allocation3], %s686_s27, %s686_s27, %s687_s28  }
  0x1f   : > { %p33_p6 = scmp.ge.s32.totalorder %s31_s25, 2  ;;  %s61_s3 = sadd.s32 1, %s671_s11 }
  0x20   : > { %p68_p4 = scmp.ne.s32.totalorder %s671_s11, %s667_s10  ;;  %p69_p9 = scmp.eq.s32.totalorder %s683_s14, 0 }
  0x21   : > { %s917_s25 = smov (%p33_p6, %s31_s25), 0  ;;  %p486_p0 = scmp.lt.s32.totalorder %s683_s14, 2 }
  0x22   : > { %p791_p12 = por %p69_p9, %p68_p4  ;;  %p797_p13 = por %p748_p2, %p68_p4 }
  0x23   : > { %s56_s6 = ssub.s32 %s679_s13, %s917_s25  ;;  %s139_s7 = sand.u32 1, %s671_s11  }
  0x24   : > { %p59_p11 = scmp.eq.s32.totalorder %s56_s6, 0  ;;  %s439_s8 = sshll.u32 %s139_s7, 6 }
  0x25   : > { %s455_s16 = sshll.u32 %s679_s13, 10  ;;  %s143_s26 = scalar_lea.vmem [#allocation5], %s439_s8 }
  0x26   : > { %s806_s15 = scalar_select %p59_p11, %s671_s11, %s61_s3  }
  0x27   : > { %s151_s24 = scalar_lea.hbm %s896_s1, %s455_s16  ;;  %s152_s27 = sshll.u32 %s143_s26, 4  ;;  %s153_s27 = int_to_ptr.vmem [resolvable:$true] %s152_s27 }
  0x28   : > { %p814_p2 = pnand %p486_p0, %p791_p12  ;;  %s140_s28 = scalar_lea.sflag [#allocation6], %s139_s7 }
  0x29   : > { %s584_s29 = scalar_lea.vmem %s153_s27, 1024  ;;  %s688_s30 = smov [#allocation5]  }
  0x2a   : > { %p573_p3 = pneg %p814_p2  ;;  %p585_p5 = scmp.ne.s32.totalorder %s153_s27, %s584_s29 }
  0x2b   : > { %s589_s3 = sshll.u32 %s688_s30, 4  ;;  %s590_s3 = int_to_ptr.vmem [resolvable:$false] %s589_s3 }
  0x2c   : > { %p587_p7 = pnand %p585_p5, %p573_p3  ;;  %s591_s6 = scalar_lea.vmem %s590_s3, 2048 }
  0x2d   : > { %p592_p4 = scmp.lt.s32.totalorder %s153_s27, %s590_s3  ;;  %p593_p9 = scmp.lt.s32.totalorder %s591_s6, %s584_s29 }
  0x2e   : > { %p588_p6 = pneg %p587_p7 }
  0x2f   : > { %p594_p11 = por %p593_p9, %p592_p4 }
  0x31   : > { %p595_p10 = pnand %p594_p11, %p588_p6 }
  0x33   : > { %598 = shalt.err (!%p595_p10)
}
  0x34   : > { %s689_s4 = smov 256   ;;  %s690_s8 = smov 16  }
  0x35   : > { %480 = dma.hbm_to_vmem [thread:$0]  (!%p814_p2), %s151_s24, 1024, %s153_s27, %s140_s28, %s689_s4, %s689_s4, %s690_s8  }
  0x36   : > { %164 = sbr.rel (%p764_p8) target bundleno = 287 (0x11f), region = 28 }
  0x3b   : > { %650 = dma.done.wait (%p744_p1), [#allocation3], 512  }
  0x3c   : > { %652 = vsyncadd (%p744_p1), [#allocation3], 4294966784  ;;  %s829_s7 = sand.u32 1, %s667_s10   ;;  %p908_p10 = scmp.ne.s32.totalorder %s901_s19, 0 }
  0x3d   : > { %s444_s16 = sshll.u32 %s829_s7, 6  ;;  %s171_s22 = scalar_lea.sflag [#allocation6], %s829_s7 }
  0x3e   : > { %s174_s23 = scalar_lea.vmem [#allocation5], %s444_s16 }
  0x3f   : > { %654 = dma.done.wait (%p908_p10), %s171_s22, 1024  }
  0x40   : > { %656 = vsyncadd (%p908_p10), %s171_s22, 4294966272  ;;  %v691_v0 = vmov 0.0   ;;  %v208_v1 = vld [vmem:[%s174_s23 + $0x38] sm:$0xff]  ;;  %v207_v2 = vld [vmem:[%s174_s23 + $0x30] sm:$0xff]  ;;  %vm209_vm0 = vcmask 261120   ;;  %s194_s17 = scalar_lea.vmem [#allocation7], %s444_s16 }
  0x41   : > { %286 = vmatprep.mubr.f32.mxu0 %v691_v0  ;;  %298 = vmatprep.mubr.f32.mxu1 %v691_v0  ;;  %v206_v3 = vld [vmem:[%s174_s23 + $0x28] sm:$0xff]  ;;  %v205_v4 = vld [vmem:[%s174_s23 + $0x20] sm:$0xff]  ;;  %v204_v5 = vld [vmem:[%s174_s23 + $0x18] sm:$0xff]  ;;  %s335_s19 = sshll.u32 %s194_s17, 4  ;;  %s456_s21 = sshll.u32 %s675_s12, 10  ;;  %s842_s19 = int_to_ptr.vmem [resolvable:$true] %s335_s19 }
  0x42   : > { %246 = vmatprep.subr.mxu0 %v208_v1  ;;  %457 = vmatprep.subr.mxu1 %v208_v1  ;;  %v203_v6 = vld [vmem:[%s174_s23 + $0x10] sm:$0xff]  ;;  %v202_v7 = vld [vmem:[%s174_s23 + $0x8] sm:$0xff]  ;;  %v201_v8 = vld [vmem:[%s174_s23] sm:$0xff]  ;;  %s847_s27 = scalar_lea.hbm %s897_s2, %s456_s21  ;;  %s320_s12 = scalar_lea.sflag [#allocation4], %s829_s7 }
  0x43   : > { %247 = vmatpush1.msra.mxu0 %v207_v2  ;;  %461 = vmatpush1.msra.mxu1 %v207_v2  ;;  %v197_v9 = vld [vmem:[#allocation2] sm:$0xff]  ;;  %v199_v10 = vld [vmem:[#allocation2 + $0x10] sm:$0xff]  ;;  %v198_v11 = vld [vmem:[#allocation2 + $0x8] sm:$0xff]  ;;  %s599_s18 = scalar_lea.vmem %s842_s19, 1024  ;;  %s692_s28 = smov [#allocation7]  }
  0x44   : > { %248 = vmatprep.subr.mxu0 %v206_v3  ;;  %458 = vmatprep.subr.mxu1 %v206_v3  ;;  %v200_v12 = vld [vmem:[#allocation2 + $0x18] sm:$0xff]  ;;  %p600_p1 = scmp.ne.s32.totalorder %s842_s19, %s599_s18  ;;  %s603_s29 = sshll.u32 %s692_s28, 4  ;;  %s604_s29 = int_to_ptr.vmem [resolvable:$false] %s603_s29 }
  0x45   : > { %249 = vmatpush1.msra.mxu0 %v205_v4  ;;  %462 = vmatpush1.msra.mxu1 %v205_v4  ;;  %s605_s30 = scalar_lea.vmem %s604_s29, 2048  ;;  %p606_p0 = scmp.lt.s32.totalorder %s842_s19, %s604_s29 }
  0x46   : > { %250 = vmatprep.subr.mxu0 %v204_v5  ;;  %459 = vmatprep.subr.mxu1 %v204_v5  ;;  %p601_p8 = pnand %p600_p1, %p797_p13  ;;  %p607_p2 = scmp.lt.s32.totalorder %s605_s30, %s599_s18 }
  0x47   : > { %251 = vmatpush1.msra.mxu0 %v203_v6  ;;  %463 = vmatpush1.msra.mxu1 %v203_v6 }
  0x48   : > { %252 = vmatprep.subr.mxu0 %v202_v7  ;;  %460 = vmatprep.subr.mxu1 %v202_v7  ;;  %p602_p12 = pneg %p601_p8  ;;  %p608_p3 = por %p607_p2, %p606_p0 }
  0x49   : > { %253 = vmatpush1.msra.mxu0 %v201_v8  ;;  %464 = vmatpush1.msra.mxu1 %v201_v8 }
  0x4a   : > { %446 = vmatmul.mubr.msk.f32.vlgmr.msra.gmra.mxu0 %vm209_vm0, %v197_v9  ;;  %448 = vmatmul.mubr.msk.f32.vlgmr.msra.gmra.mxu1 %vm209_vm0, %v199_v10  ;;  %p609_p5 = pnand %p608_p3, %p602_p12 }
  0x4b   : > { %292 = vmatprep.mubr.f32.mxu0 %v691_v0  ;;  %304 = vmatprep.mubr.f32.mxu1 %v691_v0 }
  0x4e   : > { %447 = vmatmul.mubr.msk.f32.gmra.mxu0 %vm209_vm0, %v198_v11  ;;  %449 = vmatmul.mubr.msk.f32.gmra.mxu1 %vm209_vm0, %v200_v12 }
 0x10a   : > { %v288_v13 = vpop.f32.mrf.mxu0  ;;  %v300_v14 = vpop.f32.mrf.mxu1 }
 0x10b   : > { %311 = vst [vmem:[%s194_s17] sm:$0xff] %v288_v13  ;;  %315 = vst [vmem:[%s194_s17 + $0x20] sm:$0xff] %v300_v14 }
 0x10c   : > { %v290_v15 = vpop.f32.mrf.mxu0  ;;  %v302_v16 = vpop.f32.mrf.mxu1 }
 0x10d   : > { %312 = vst [vmem:[%s194_s17 + $0x8] sm:$0xff] %v290_v15  ;;  %316 = vst [vmem:[%s194_s17 + $0x28] sm:$0xff] %v302_v16 }
 0x10e   : > { %v294_v17 = vpop.f32.mrf.mxu0  ;;  %v306_v18 = vpop.f32.mrf.mxu1 }
 0x10f   : > { %313 = vst [vmem:[%s194_s17 + $0x10] sm:$0xff] %v294_v17  ;;  %317 = vst [vmem:[%s194_s17 + $0x30] sm:$0xff] %v306_v18 }
 0x110   : > { %v296_v19 = vpop.f32.mrf.mxu0  ;;  %v308_v20 = vpop.f32.mrf.mxu1 }
 0x111   : > { %314 = vst [vmem:[%s194_s17 + $0x18] sm:$0xff] %v296_v19  ;;  %318 = vst [vmem:[%s194_s17 + $0x38] sm:$0xff] %v308_v20 }
 0x112   : > { %612 = shalt.err (!%p609_p5)
}
 0x113   : > { %s613_s3 = scalar_lea.hbm %s847_s27, 1024  ;;  %s617_s8 = scalar_lea.hbm %s897_s2, 2048 }
 0x114   : > { %p614_p7 = scmp.ne.s32.totalorder %s847_s27, %s613_s3  ;;  %p618_p9 = scmp.lt.s32.totalorder %s847_s27, %s897_s2 }
 0x115   : > { %p619_p11 = scmp.lt.s32.totalorder %s617_s8, %s613_s3 }
 0x116   : > { %p615_p6 = pnand %p614_p7, %p797_p13 }
 0x117   : > { %p620_p10 = por %p619_p11, %p618_p9 }
 0x118   : > { %p616_p4 = pneg %p615_p6 }
 0x11a   : > { %p621_p1 = pnand %p620_p10, %p616_p4 }
 0x11c   : > { %624 = shalt.err (!%p621_p1)
}
 0x11d   : > { %s693_s23 = smov 256   ;;  %s694_s17 = smov 16  }
 0x11e   : > { %471 = dma.vmem_to_hbm [thread:$0]  (%p797_p13), %s842_s19, 1024, %s847_s27, %s320_s12, %s693_s23, %s693_s23, %s694_s17  }
 0x11f PF: > { %s350_s21 = sand.u32 1, %s663_s9   ;;  %p909_p8 = scmp.ne.s32.totalorder %s902_s20, 0 }
 0x120   : > { %p910_p12 = scmp.ge.s32.totalorder %s683_s14, 2  ;;  %s351_s24 = scalar_lea.sflag [#allocation4], %s350_s21 }
 0x122   : > { %p482_p0 = pnand %p910_p12, %p909_p8 }
 0x124   : > { %p483_p2 = pneg %p482_p0 }
 0x126   : > { %658 = dma.done.wait (%p483_p2), %s351_s24, 1024  }
 0x127   : > { %660 = vsyncadd (%p483_p2), %s351_s24, 4294966272  ;;  %s19_s14 = sadd.s32 1, %s683_s14   ;;  %s911_s9 = smov %s667_s10 }
 0x128   : > { %p16_p3 = scmp.ge.s32.totalorder %s19_s14, 4   ;;  %s912_s10 = smov %s671_s11 }
 0x129   : > { %s913_s11 = smov %s806_s15  ;;  %s914_s12 = smov %s679_s13 }
 0x12a   : > { %s915_s13 = smov %s917_s25  ;;  %18 = sbr.rel (!%p16_p3) target bundleno = 7 (0x7), region = 78 }
 0x12f   :  { %356 = vsyncpa [#allocation3], 1 }
 0x130   :  { %358 = vsyncpa [#allocation3 + $0x1], 1 }
 0x131   :  { %359 = vsyncpa [#allocation6], 1 }
 0x132   :  { %361 = vsyncpa [#allocation6 + $0x1], 1 }
 0x133   :  { %362 = vsyncpa [#allocation4], 1 }
 0x134   :  { %364 = vsyncpa [#allocation4 + $0x1], 1 }

</bundles_post_ra>
